<compile_context>
chip_gen: v6e
topology: v6e:2x2x1
jax: 0.10.0
libtpu: 0.0.40
codegen_flags: <defaults>
</compile_context>

<pallas_src>
import numpy as np
import jax
import jax.numpy as jnp
from jax.experimental import pallas as pl
from jax.experimental.pallas import tpu as pltpu

HIDDEN = 64        # logical hidden width of the PyTorch module
HIDDEN_PAD = 128   # padded to a full 128-lane vreg
_LANE = 128
_SUBLANE = 8


def _round_up(n, m):
    return ((n + m - 1) // m) * m


def _default_tb():
    """Default batch tile: big tiles amortize the ~0.35us/step pipeline
    overhead.  128 MiB-VMEM parts (v5e/v6e) -> 8192; 64 MiB (v7x) -> 4096."""
    try:
        info = pltpu.get_tpu_info()
        vmem = int(getattr(info, "vmem_capacity_bytes", 64 << 20))
    except Exception:
        vmem = 64 << 20
    return 8192 if vmem >= (96 << 20) else 4096


def _pick_tb(B, tb_request):
    """Pick the batch tile.

    * Tiny batches (< 256) use a single full block (block dims equal to the
      array dims, so no (8,128) constraint applies).
    * Otherwise tiles are multiples of 128 (lane-dense output blocks) and are
      capped at ceil(B/2) so the grid always has >= 2 steps — lets the
      "parallel" grid axis shard across v7x's 2 TensorCores (harmless on
      single-TC v5e/v6e).
    """
    if B < 2 * _LANE:
        return B
    tb = _default_tb() if tb_request is None else int(tb_request)
    tb = max(_LANE, (tb // _LANE) * _LANE)
    tb = min(tb, _round_up(pl.cdiv(B, 2), _LANE))
    return tb


def _valuenet_kernel(x_ref, w1_ref, b1_ref, w2_ref, b2_ref, w3_ref, b3_ref, o_ref):
    """One batch tile, computed in transposed (feature-major) orientation.

    x_ref : (tb, in_dim)   matmul dtype (bf16 by default)
    w1_ref: (H, in_dim)    w2_ref: (H, H)    w3_ref: (out_dim, H)  matmul dtype
    b1/b2 : (H, 1) f32     b3: (out_dim, 1) f32
    o_ref : (out_dim, tb)  f32  — lane-dense output block
    """
    # Layer 1: hT = W1 @ x^T -> (H, tb).  NT contraction over in_dim (same
    # 'qd,kd->qk' pattern as attention scores); f32 MXU accumulation.
    h = jnp.einsum("hd,nd->hn", w1_ref[...], x_ref[...],
                   preferred_element_type=jnp.float32)
    h = jnp.maximum(h + b1_ref[...], 0.0)          # bias + ReLU stay f32 (VPU)

    # Layer 2: (H, H) @ (H, tb) on the MXU, f32 accumulation.
    h = jnp.dot(w2_ref[...], h.astype(w2_ref.dtype),
                preferred_element_type=jnp.float32)
    h = jnp.maximum(h + b2_ref[...], 0.0)

    # Layer 3 + bias: (out_dim, H) @ (H, tb) — tiny-M MXU matmul; the result
    # lands lane-dense and is stored with full-width vst's.
    o = jnp.dot(w3_ref[...], h.astype(w3_ref.dtype),
                preferred_element_type=jnp.float32)
    o_ref[...] = o + b3_ref[...]


def valuenet_forward(x, params, *, tb=None, matmul_dtype=jnp.bfloat16):
    """Fused ValueNet forward.

    x:            (B, in_dim) f32 observations.
    params:       torch-layout (w1, b1, w2, b2, w3, b3); w* = (out, in), b* = (out,).
    tb:           batch tile (None -> auto from VMEM capacity).
    matmul_dtype: jnp.bfloat16 (default; f32 accumulation / bias / ReLU kept,
                  ~1e-2 relative error vs f32 — fine for a PPO critic) or
                  jnp.float32 for bit-faithful math.
    """
    if x.ndim == 1:
        return valuenet_forward(x[None, :], params, tb=tb,
                                matmul_dtype=matmul_dtype)[0]

    w1, b1, w2, b2, w3, b3 = params
    B, in_dim = x.shape
    out_dim = w3.shape[0]
    assert w1.shape == (HIDDEN, in_dim) and w2.shape == (HIDDEN, HIDDEN)
    assert w3.shape == (out_dim, HIDDEN)

    H = HIDDEN_PAD
    ph = H - HIDDEN
    # Hidden-dim zero padding (exact) + one-time pre-cast of MXU operands.
    # Under jit these fold into constants / fuse with whatever produced x.
    w1p = jnp.pad(w1, ((0, ph), (0, 0))).astype(matmul_dtype)    # (H, in_dim)
    w2p = jnp.pad(w2, ((0, ph), (0, ph))).astype(matmul_dtype)   # (H, H)
    w3p = jnp.pad(w3, ((0, 0), (0, ph))).astype(matmul_dtype)    # (out_dim, H)
    b1p = jnp.pad(b1, (0, ph)).reshape(H, 1).astype(jnp.float32)
    b2p = jnp.pad(b2, (0, ph)).reshape(H, 1).astype(jnp.float32)
    b3p = b3.reshape(out_dim, 1).astype(jnp.float32)
    x_in = x.astype(matmul_dtype)        # ship x to the kernel already in bf16

    tb = _pick_tb(B, tb)
    grid = (pl.cdiv(B, tb),)             # ragged tail -> Pallas partial blocks

    resident = lambda i: (0, 0)          # same block every step: DMA'd once, stays in VMEM
    in_specs = [
        pl.BlockSpec((tb, in_dim), lambda i: (i, 0)),   # x: batch-tiled, double-buffered
        pl.BlockSpec((H, in_dim), resident),            # W1
        pl.BlockSpec((H, 1), resident),                 # b1
        pl.BlockSpec((H, H), resident),                 # W2
        pl.BlockSpec((H, 1), resident),                 # b2
        pl.BlockSpec((out_dim, H), resident),           # W3
        pl.BlockSpec((out_dim, 1), resident),           # b3 (fused epilogue add)
    ]
    out_spec = pl.BlockSpec((out_dim, tb), lambda i: (0, i))   # lane-dense output

    itemsize = jnp.dtype(matmul_dtype).itemsize
    cost = pl.CostEstimate(
        flops=2 * B * (in_dim * H + H * H + H * out_dim),
        transcendentals=0,
        bytes_accessed=int(B * in_dim * itemsize + B * out_dim * 4
                           + (w1p.size + w2p.size + w3p.size) * itemsize
                           + (b1p.size + b2p.size + b3p.size) * 4),
    )

    # VMEM budget: double-buffered x/out blocks + resident weights + live
    # (H, tb) f32 intermediates, with 2x headroom, capped under v7x's 64 MiB.
    x_blk_vmem = tb * _LANE * itemsize          # in_dim lane-pads to 128
    out_blk_vmem = _SUBLANE * tb * 4            # out_dim sublane-pads to 8
    h_vmem = 4 * H * tb * 4                     # f32 intermediates + bf16 casts
    w_vmem = 2 * (3 * H * _LANE * 4)            # resident weights/biases (generous)
    need = 2 * (x_blk_vmem + out_blk_vmem) + h_vmem + w_vmem
    vmem_limit = int(min(64 << 20, max(32 << 20, 2 * need)))

    out_t = pl.pallas_call(
        _valuenet_kernel,
        out_shape=jax.ShapeDtypeStruct((out_dim, B), jnp.float32),
        grid_spec=pl.GridSpec(grid=grid, in_specs=in_specs, out_specs=out_spec),
        compiler_params=pltpu.CompilerParams(
            dimension_semantics=("parallel",),   # megacore / v7x 2-TC batch split
            vmem_limit_bytes=vmem_limit,
        ),
        cost_estimate=cost,
    )(x_in, w1p, b1p, w2p, b2p, w3p, b3p)

    # (out_dim, B) -> (B, out_dim).  For the critic (out_dim == 1) this is a
    # free, layout-preserving reshape; for small out_dim > 1 it is a tiny
    # transpose of the already lane-dense-written output.
    if out_dim == 1:
        return out_t.reshape(B, 1)
    return out_t.T


# ----------------------------------------------------------------------------
# Torch-equivalent init + pure-JAX reference
# ----------------------------------------------------------------------------
def _orthogonal(key, shape, gain):
    """Deterministic orthogonal init (same spirit as torch.nn.init.orthogonal_)."""
    rows, cols = shape
    n = max(rows, cols)
    a = jax.random.normal(key, (n, n), dtype=jnp.float32)
    q, r = jnp.linalg.qr(a)
    q = q * jnp.where(jnp.diag(r) >= 0.0, 1.0, -1.0)[None, :]
    return gain * q[:rows, :cols]


def init_valuenet_params(key, in_dim, out_dim):
    """Torch-layout params: w (out_features, in_features), b (out_features,)."""
    k1, k2, k3 = jax.random.split(key, 3)
    std = float(np.sqrt(2.0))
    w1 = _orthogonal(k1, (HIDDEN, in_dim), std)
    w2 = _orthogonal(k2, (HIDDEN, HIDDEN), std)
    w3 = _orthogonal(k3, (out_dim, HIDDEN), 1.0)
    b1 = jnp.zeros((HIDDEN,), jnp.float32)
    b2 = jnp.zeros((HIDDEN,), jnp.float32)
    b3 = jnp.zeros((out_dim,), jnp.float32)
    return w1, b1, w2, b2, w3, b3


def valuenet_reference(x, params, matmul_dtype=jnp.float32):
    """Pure-JAX reference mirroring the kernel's numerics: matmul operands
    rounded to matmul_dtype, products/accumulation in f32, bias+ReLU in f32."""
    w1, b1, w2, b2, w3, b3 = params

    def dot(a, b):
        return jnp.matmul(a.astype(matmul_dtype).astype(jnp.float32),
                          b.astype(matmul_dtype).astype(jnp.float32),
                          precision=jax.lax.Precision.HIGHEST)

    h = jnp.maximum(dot(x, w1.T) + b1, 0.0)
    h = jnp.maximum(dot(h, w2.T) + b2, 0.0)
    return dot(h, w3.T) + b3


if __name__ == "__main__":
    key = jax.random.PRNGKey(0)
    k_p, k_x, k_x2, k_p2, k_b = jax.random.split(key, 5)
    in_dim = 16

    # --- Case A: PPO critic (out_dim=1), tiny batch, bf16 default ----------
    params = init_valuenet_params(k_p, in_dim, 1)
    obs = jax.random.normal(k_x, (8, in_dim), dtype=jnp.float32)
    out = jax.block_until_ready(valuenet_forward(obs, params))
    assert out.shape == (8, 1)
    ref = valuenet_reference(obs, params, jnp.bfloat16)
    np.testing.assert_allclose(np.asarray(out), np.asarray(ref),
                               rtol=1e-2, atol=1e-2)

    # --- Case B: multi-step grid with ragged tail (B=300, tb=128 -> 3 steps,
    #     last block only 44 valid rows) + nonzero biases to exercise the
    #     fused in-kernel bias adds.
    kb1, kb2, kb3 = jax.random.split(k_b, 3)
    params_b = (params[0], 0.1 * jax.random.normal(kb1, (HIDDEN,), dtype=jnp.float32),
                params[2], 0.1 * jax.random.normal(kb2, (HIDDEN,), dtype=jnp.float32),
                params[4], 0.1 * jax.random.normal(kb3, (1,), dtype=jnp.float32))
    obs2 = jax.random.normal(k_x2, (300, in_dim), dtype=jnp.float32)
    out2 = jax.block_until_ready(valuenet_forward(obs2, params_b, tb=128))
    assert out2.shape == (300, 1)
    ref2 = valuenet_reference(obs2, params_b, jnp.bfloat16)
    np.testing.assert_allclose(np.asarray(out2), np.asarray(ref2),
                               rtol=1e-2, atol=1e-2)

    # --- Case C: general out_dim > 1, f32 (bit-faithful) mode --------------
    params3 = init_valuenet_params(k_p2, in_dim, 4)
    out3 = jax.block_until_ready(
        valuenet_forward(obs, params3, matmul_dtype=jnp.float32))
    assert out3.shape == (8, 4)
    ref3 = valuenet_reference(obs, params3, jnp.float32)
    np.testing.assert_allclose(np.asarray(out3), np.asarray(ref3),
                               rtol=1e-4, atol=1e-3)

    print("KERNEL_OK")
</pallas_src>

<mosaic_0001>
module attributes {stable_mosaic.version = 11 : i64} {
  func.func @_valuenet_kernel(%arg0: i32, %arg1: memref<8x16xbf16, #tpu.memory_space<vmem>>, %arg2: memref<128x16xbf16, #tpu.memory_space<vmem>>, %arg3: memref<128x1xf32, #tpu.memory_space<vmem>>, %arg4: memref<128x128xbf16, #tpu.memory_space<vmem>>, %arg5: memref<128x1xf32, #tpu.memory_space<vmem>>, %arg6: memref<1x128xbf16, #tpu.memory_space<vmem>>, %arg7: memref<1x1xf32, #tpu.memory_space<vmem>>, %arg8: memref<1x8xf32, #tpu.memory_space<vmem>>) attributes {dimension_semantics = [#tpu.dimension_semantics<parallel>], iteration_bounds = array<i64: 1>, scalar_prefetch = 0 : i64, scratch_operands = 0 : i64, tpu.core_type = #tpu.core_type<tc>, window_params = [{transform_indices = @transform_0, window_bounds = array<i64: 8, 16>}, {pipeline_mode = #tpu.pipeline_mode<synchronous>, transform_indices = @transform_1, window_bounds = array<i64: 128, 16>}, {pipeline_mode = #tpu.pipeline_mode<synchronous>, transform_indices = @transform_2, window_bounds = array<i64: 128, 1>}, {pipeline_mode = #tpu.pipeline_mode<synchronous>, transform_indices = @transform_3, window_bounds = array<i64: 128, 128>}, {pipeline_mode = #tpu.pipeline_mode<synchronous>, transform_indices = @transform_4, window_bounds = array<i64: 128, 1>}, {pipeline_mode = #tpu.pipeline_mode<synchronous>, transform_indices = @transform_5, window_bounds = array<i64: 1, 128>}, {pipeline_mode = #tpu.pipeline_mode<synchronous>, transform_indices = @transform_6, window_bounds = array<i64: 1, 1>}, {transform_indices = @transform_7, window_bounds = array<i64: 1, 8>}]} {
    %c0 = arith.constant 0 : index
    %c0_0 = arith.constant 0 : index
    %0 = vector.load %arg2[%c0, %c0_0] : memref<128x16xbf16, #tpu.memory_space<vmem>>, vector<128x16xbf16>
    %c0_1 = arith.constant 0 : index
    %c0_2 = arith.constant 0 : index
    %1 = vector.load %arg1[%c0_1, %c0_2] : memref<8x16xbf16, #tpu.memory_space<vmem>>, vector<8x16xbf16>
    "tpu.trace_start"() <{level = 10 : i32, message = "hd,nd->hn"}> : () -> ()
    %cst = arith.constant dense<0.000000e+00> : vector<128x8xf32>
    %2 = tpu.matmul %0, %1, %cst {dimension_numbers = #tpu.dot_dimension_numbers<[1], [1], [0], [0], [0, 0, 1, 0], [], []>} : vector<128x16xbf16>, vector<8x16xbf16>, vector<128x8xf32> -> vector<128x8xf32>
    "tpu.trace_stop"() : () -> ()
    %c0_3 = arith.constant 0 : index
    %c0_4 = arith.constant 0 : index
    %3 = vector.load %arg3[%c0_3, %c0_4] : memref<128x1xf32, #tpu.memory_space<vmem>>, vector<128x1xf32>
    %4 = vector.broadcast %3 : vector<128x1xf32> to vector<128x8xf32>
    %5 = arith.addf %2, %4 : vector<128x8xf32>
    %cst_5 = arith.constant 0.000000e+00 : f32
    %6 = vector.broadcast %cst_5 : f32 to vector<128x8xf32>
    %7 = arith.maximumf %5, %6 : vector<128x8xf32>
    %c0_6 = arith.constant 0 : index
    %c0_7 = arith.constant 0 : index
    %8 = vector.load %arg4[%c0_6, %c0_7] : memref<128x128xbf16, #tpu.memory_space<vmem>>, vector<128x128xbf16>
    %9 = arith.truncf %7 : vector<128x8xf32> to vector<128x8xbf16>
    %cst_8 = arith.constant dense<0.000000e+00> : vector<128x8xf32>
    %10 = tpu.matmul %8, %9, %cst_8 {dimension_numbers = #tpu.dot_dimension_numbers<[1], [0], [0], [1], [0, 0, 1, 1], [], []>} : vector<128x128xbf16>, vector<128x8xbf16>, vector<128x8xf32> -> vector<128x8xf32>
    %c0_9 = arith.constant 0 : index
    %c0_10 = arith.constant 0 : index
    %11 = vector.load %arg5[%c0_9, %c0_10] : memref<128x1xf32, #tpu.memory_space<vmem>>, vector<128x1xf32>
    %12 = vector.broadcast %11 : vector<128x1xf32> to vector<128x8xf32>
    %13 = arith.addf %10, %12 : vector<128x8xf32>
    %cst_11 = arith.constant 0.000000e+00 : f32
    %14 = vector.broadcast %cst_11 : f32 to vector<128x8xf32>
    %15 = arith.maximumf %13, %14 : vector<128x8xf32>
    %c0_12 = arith.constant 0 : index
    %c0_13 = arith.constant 0 : index
    %16 = vector.load %arg6[%c0_12, %c0_13] : memref<1x128xbf16, #tpu.memory_space<vmem>>, vector<1x128xbf16>
    %17 = arith.truncf %15 : vector<128x8xf32> to vector<128x8xbf16>
    %cst_14 = arith.constant dense<0.000000e+00> : vector<1x8xf32>
    %18 = tpu.matmul %16, %17, %cst_14 {dimension_numbers = #tpu.dot_dimension_numbers<[1], [0], [0], [1], [0, 0, 1, 1], [], []>} : vector<1x128xbf16>, vector<128x8xbf16>, vector<1x8xf32> -> vector<1x8xf32>
    %c0_15 = arith.constant 0 : index
    %c0_16 = arith.constant 0 : index
    %19 = vector.load %arg7[%c0_15, %c0_16] : memref<1x1xf32, #tpu.memory_space<vmem>>, vector<1x1xf32>
    %20 = vector.broadcast %19 : vector<1x1xf32> to vector<1x8xf32>
    %21 = arith.addf %18, %20 : vector<1x8xf32>
    %c0_17 = arith.constant 0 : index
    %c0_18 = arith.constant 0 : index
    %22 = vector.load %arg8[%c0_17, %c0_18] : memref<1x8xf32, #tpu.memory_space<vmem>>, vector<1x8xf32>
    tpu.vector_store %arg8[%c0_17, %c0_18], %21 {strides = array<i32>} : memref<1x8xf32, #tpu.memory_space<vmem>>, vector<1x8xf32>,
    return
  }
  func.func @transform_0(%arg0: i32) -> (i32, i32) {
    %c0_i32 = arith.constant 0 : i32
    %c0_i32_0 = arith.constant 0 : i32
    return %arg0, %c0_i32 : i32, i32
  }
  func.func @transform_1(%arg0: i32) -> (i32, i32) {
    %c0_i32 = arith.constant 0 : i32
    %c0_i32_0 = arith.constant 0 : i32
    %c0_i32_1 = arith.constant 0 : i32
    return %c0_i32, %c0_i32_0 : i32, i32
  }
  func.func @transform_2(%arg0: i32) -> (i32, i32) {
    %c0_i32 = arith.constant 0 : i32
    %c0_i32_0 = arith.constant 0 : i32
    %c0_i32_1 = arith.constant 0 : i32
    return %c0_i32, %c0_i32_0 : i32, i32
  }
  func.func @transform_3(%arg0: i32) -> (i32, i32) {
    %c0_i32 = arith.constant 0 : i32
    %c0_i32_0 = arith.constant 0 : i32
    %c0_i32_1 = arith.constant 0 : i32
    return %c0_i32, %c0_i32_0 : i32, i32
  }
  func.func @transform_4(%arg0: i32) -> (i32, i32) {
    %c0_i32 = arith.constant 0 : i32
    %c0_i32_0 = arith.constant 0 : i32
    %c0_i32_1 = arith.constant 0 : i32
    return %c0_i32, %c0_i32_0 : i32, i32
  }
  func.func @transform_5(%arg0: i32) -> (i32, i32) {
    %c0_i32 = arith.constant 0 : i32
    %c0_i32_0 = arith.constant 0 : i32
    %c0_i32_1 = arith.constant 0 : i32
    return %c0_i32, %c0_i32_0 : i32, i32
  }
  func.func @transform_6(%arg0: i32) -> (i32, i32) {
    %c0_i32 = arith.constant 0 : i32
    %c0_i32_0 = arith.constant 0 : i32
    %c0_i32_1 = arith.constant 0 : i32
    return %c0_i32, %c0_i32_0 : i32, i32
  }
  func.func @transform_7(%arg0: i32) -> (i32, i32) {
    %c0_i32 = arith.constant 0 : i32
    %c0_i32_0 = arith.constant 0 : i32
    return %c0_i32, %arg0 : i32, i32
  }
}

</mosaic_0001>

<bundles_post_ra>
// kernel: tpu_custom_call.1
= control target key start
LH: loop header
LB: loop body
LE: loop exit
PB: predicated region body
PF: predicated region fallthrough
CT: control target
= control target key end

     0   :  { %s1090_s0 = inlined_call_operand.vmem [shape: bf16[8,16], index: 0, kind: input, shape index: {}]   ;;  %s1091_s1 = inlined_call_operand.vmem [shape: bf16[128,16], index: 1, kind: input, shape index: {}]   ;;  %s1092_s2 = inlined_call_operand.vmem [shape: f32[128,1], index: 2, kind: input, shape index: {}]   ;;  %s1093_s3 = inlined_call_operand.vmem [shape: bf16[128,128], index: 3, kind: input, shape index: {}]   ;;  %s1094_s4 = inlined_call_operand.vmem [shape: f32[128,1], index: 4, kind: input, shape index: {}]   ;;  %s1095_s5 = inlined_call_operand.vmem [shape: bf16[1,128], index: 5, kind: input, shape index: {}]   ;;  %s1096_s6 = inlined_call_operand.<no memory space> [shape: f32[1,1], index: 6, kind: input, shape index: {}]   ;;  %s1097_s7 = inlined_call_operand.hbm [shape: f32[1,8], index: 7, kind: output, shape index: {}]  }
   0x1   :  { %v12_v0 = vstv %s1096_s6 }
   0x2   :  { %13 = vst [vmem:[#allocation2] sm:$0x1] %v12_v0 }
   0x3   :  { %v46_v1 = vld [vmem:[%s1090_s0] sm:$0xf]  ;;  %vm183_vm0 = vcmask 130048   ;;  %v853_v4 = vmov 0   ;;  %v816_v5 = vld [vmem:[%s1091_s1 + $0x8] sm:$0xff]   ;;  %v817_v6 = vld [vmem:[%s1091_s1 + $0x10] sm:$0xff]  }
   0x4   :  { %v815_v2 = vld [vmem:[%s1091_s1] sm:$0xff]   ;;  %808 = vmatprep.subr.msk.bf16.mxu0 %vm183_vm0, %v46_v1  ;;  %v209_v3 = vsel %vm183_vm0, %v46_v1, 0  ;;  %813 = vset.pattern.permute.xlu0 %v853_v4  ;;  %v61_v7 = vld [vmem:[%s1092_s2 + $0x70] sm:$0xff]  ;;  %v62_v9 = vld [vmem:[%s1092_s2 + $0x78] sm:$0xff] }
   0x5   :  { %739 = vmatpush3.bf16.xpose.msra.mxu0 %v209_v3  ;;  %740 = vmatprep.mubr.msk.bf16.mxu0 %vm183_vm0, %v815_v2  ;;  %v59_v8 = vld [vmem:[%s1092_s2 + $0x60] sm:$0xff]  ;;  %v60_v10 = vld [vmem:[%s1092_s2 + $0x68] sm:$0xff]  ;;  %v818_v11 = vld [vmem:[%s1091_s1 + $0x18] sm:$0xff]  }
   0x6   :  { %814 = vset.pattern.permute.xlu1 %v853_v4  ;;  %135 = vperm.xlu0 %813, %v61_v7   ;;  %v819_v12 = vld [vmem:[%s1091_s1 + $0x20] sm:$0xff]   ;;  %v57_v13 = vld [vmem:[%s1092_s2 + $0x50] sm:$0xff]  ;;  %v58_v14 = vld [vmem:[%s1092_s2 + $0x58] sm:$0xff] }
   0x7   :  { %125 = vperm.xlu1 %814, %v59_v8   ;;  %v55_v15 = vld [vmem:[%s1092_s2 + $0x40] sm:$0xff]  ;;  %v820_v16 = vld [vmem:[%s1091_s1 + $0x28] sm:$0xff]   ;;  %v821_v18 = vld [vmem:[%s1091_s1 + $0x30] sm:$0xff]  }
   0x8   :  { %v56_v17 = vld [vmem:[%s1092_s2 + $0x48] sm:$0xff]  ;;  %v53_v19 = vld [vmem:[%s1092_s2 + $0x30] sm:$0xff]  ;;  %v54_v20 = vld [vmem:[%s1092_s2 + $0x38] sm:$0xff] }
   0xa   :  { %140 = vperm.xlu0 %813, %v62_v9  }
   0xb   :  { %130 = vperm.xlu1 %814, %v60_v10  }
   0xc   :  { %741 = vmatmul.mubr.msk.bf16.vlgmr.msra.gmra.mxu0 %vm183_vm0, %v816_v5 }
   0xd   :  { %744 = vmatprep.mubr.msk.bf16.mxu0 %vm183_vm0, %v817_v6 }
   0xe   :  { %115 = vperm.xlu0 %813, %v57_v13  }
   0xf   :  { %120 = vperm.xlu1 %814, %v58_v14  }
  0x12   :  { %105 = vperm.xlu0 %813, %v55_v15  }
  0x13   :  { %110 = vperm.xlu1 %814, %v56_v17  }
  0x14   :  { %745 = vmatmul.mubr.msk.bf16.gmra.mxu0 %vm183_vm0, %v818_v11 }
  0x15   :  { %748 = vmatprep.mubr.msk.bf16.mxu0 %vm183_vm0, %v819_v12 }
  0x16   :  { %14 = vsyncpa [#allocation4], 0  ;;  %95 = vperm.xlu0 %813, %v53_v19   ;;  %v51_v21 = vld [vmem:[%s1092_s2 + $0x20] sm:$0xff]  ;;  %v52_v22 = vld [vmem:[%s1092_s2 + $0x28] sm:$0xff]  ;;  %vm855_vm1 = vmmov 0   ;;  %s856_s20 = smov [#allocation3]  }
  0x17   :  { %100 = vperm.xlu1 %814, %v54_v20   ;;  %v822_v23 = vld [vmem:[%s1091_s1 + $0x38] sm:$0xff]   ;;  %v49_v24 = vld [vmem:[%s1092_s2 + $0x10] sm:$0xff]  ;;  %v47_v26 = vld [vmem:[%s1092_s2] sm:$0xff]  ;;  %s672_s21 = sshll.u32 %s856_s20, 4  ;;  %vm664_vm2 = vcmask 57344   ;;  %s673_s21 = int_to_ptr.vmem [resolvable:$true] %s672_s21 }
  0x18   :  { %v50_v25 = vld [vmem:[%s1092_s2 + $0x18] sm:$0xff]  ;;  %v48_v27 = vld [vmem:[%s1092_s2 + $0x8] sm:$0xff]  ;;  %v362_v28 = vld [vmem:[%s1094_s4 + $0x70] sm:$0xff]  ;;  %s831_s22 = scalar_lea.vmem %s673_s21, 16  ;;  %s835_s23 = scalar_lea.vmem %s673_s21, 32 }
  0x19   :  { %v363_v29 = vld [vmem:[%s1094_s4 + $0x78] sm:$0xff]  ;;  %v360_v30 = vld [vmem:[%s1094_s4 + $0x60] sm:$0xff]  ;;  %v361_v31 = vld [vmem:[%s1094_s4 + $0x68] sm:$0xff]  ;;  %p832_p0 = scmp.ne.s32.totalorder %s673_s21, %s831_s22  ;;  %p836_p1 = scmp.lt.s32.totalorder %s673_s21, %s673_s21 }
  0x1a   :  { %85 = vperm.xlu0 %813, %v51_v21   ;;  %v358_v32 = vld [vmem:[%s1094_s4 + $0x50] sm:$0xff]  ;;  %v359_v33 = vld [vmem:[%s1094_s4 + $0x58] sm:$0xff]  ;;  %v356_v34 = vld [vmem:[%s1094_s4 + $0x40] sm:$0xff]  ;;  %p837_p2 = scmp.lt.s32.totalorder %s835_s23, %s831_s22 }
  0x1b   :  { %90 = vperm.xlu1 %814, %v52_v22   ;;  %v357_v35 = vld [vmem:[%s1094_s4 + $0x48] sm:$0xff]  ;;  %v354_v36 = vld [vmem:[%s1094_s4 + $0x30] sm:$0xff]  ;;  %v355_v37 = vld [vmem:[%s1094_s4 + $0x38] sm:$0xff] }
  0x1c   :  { %749 = vmatmul.mubr.msk.bf16.gmra.mxu0 %vm183_vm0, %v820_v16  ;;  %v352_v38 = vld [vmem:[%s1094_s4 + $0x20] sm:$0xff]  ;;  %v353_v39 = vld [vmem:[%s1094_s4 + $0x28] sm:$0xff]  ;;  %v350_v40 = vld [vmem:[%s1094_s4 + $0x10] sm:$0xff]  ;;  %p838_p3 = por %p837_p2, %p836_p1 }
  0x1d   :  { %752 = vmatprep.mubr.msk.bf16.mxu0 %vm183_vm0, %v821_v18  ;;  %v351_v41 = vld [vmem:[%s1094_s4 + $0x18] sm:$0xff]  ;;  %v348_v42 = vld [vmem:[%s1094_s4] sm:$0xff]  ;;  %v349_v43 = vld [vmem:[%s1094_s4 + $0x8] sm:$0xff] }
  0x1e   :  { %75 = vperm.xlu0 %813, %v49_v24   ;;  %v614_v44 = vld [vmem:[#allocation2] sm:$0x1]  ;;  %p839_p4 = pnand %p838_p3, %p832_p0 }
  0x1f   :  { %80 = vperm.xlu1 %814, %v50_v25   ;;  %v823_v45 = vld [vmem:[%s1093_s3] sm:$0xff]  }
  0x20   :  { %772 = vmatprep.mubr.bf16.mxu1 %v823_v45 }
  0x22   :  { %65 = vperm.xlu0 %813, %v47_v26  }
  0x23   :  { %70 = vperm.xlu1 %814, %v48_v27  }
  0x24   :  { %753 = vmatmul.mubr.msk.bf16.gmra.mxu0 %vm183_vm0, %v822_v23 }
  0x26   :  { %436 = vperm.xlu0 %813, %v362_v28  }
  0x27   :  { %441 = vperm.xlu1 %814, %v363_v29  }
  0x2a   :  { %426 = vperm.xlu0 %813, %v360_v30  }
  0x2b   :  { %431 = vperm.xlu1 %814, %v361_v31  }
  0x2e   :  { %416 = vperm.xlu0 %813, %v358_v32  }
  0x2f   :  { %421 = vperm.xlu1 %814, %v359_v33  }
  0x32   :  { %406 = vperm.xlu0 %813, %v356_v34  }
  0x33   :  { %411 = vperm.xlu1 %814, %v357_v35  }
  0x36   :  { %396 = vperm.xlu0 %813, %v354_v36  }
  0x37   :  { %401 = vperm.xlu1 %814, %v355_v37  }
  0x3a   :  { %386 = vperm.xlu0 %813, %v352_v38  }
  0x3b   :  { %391 = vperm.xlu1 %814, %v353_v39  }
  0x3e   :  { %376 = vperm.xlu0 %813, %v350_v40  }
  0x3f   :  { %381 = vperm.xlu1 %814, %v351_v41  }
  0x42   :  { %366 = vperm.xlu0 %813, %v348_v42  }
  0x43   :  { %371 = vperm.xlu1 %814, %v349_v43  }
  0x46   :  { %617 = vperm.xlu0 %813, %v614_v44  }
  0x81   :  { %v136_v52 = vpop.permute.xlu0 %135 }
  0x82   :  { %v126_v50 = vpop.permute.xlu1 %125 }
  0x85   :  { %v141_v57 = vpop.permute.xlu0 %140 }
  0x86   :  { %v131_v55 = vpop.permute.xlu1 %130 }
  0x89   :  { %v116_v62 = vpop.permute.xlu0 %115 }
  0x8a   :  { %v121_v60 = vpop.permute.xlu1 %120 }
  0x8d   :  { %v106_v4 = vpop.permute.xlu0 %105 }
  0x8e   :  { %v111_v1 = vpop.permute.xlu1 %110 }
  0x91   :  { %v96_v18 = vpop.permute.xlu0 %95 }
  0x92   :  { %v101_v13 = vpop.permute.xlu1 %100 }
  0x95   :  { %v86_v28 = vpop.permute.xlu0 %85 }
  0x96   :  { %v91_v24 = vpop.permute.xlu1 %90 }
  0x99   :  { %v76_v37 = vpop.permute.xlu0 %75 }
  0x9a   :  { %v81_v34 = vpop.permute.xlu1 %80 }
  0x9e   :  { %v71_v43 = vpop.permute.xlu1 %70 }
  0xcc   :  { %v1036_v46 = vpop.f32.mrf.mxu0 }
  0xcd   :  { %v254_v41 = vadd.f32 %v1036_v46, %v76_v37  ;;  %v824_v46 = vld [vmem:[%s1093_s3 + $0x8] sm:$0xff]  }
  0xce   :  { %v1038_v47 = vpop.f32.mrf.mxu0 }
  0xd0   :  { %v743_v48 = vpop.f32.mrf.mxu0 }
  0xd1   :  { %v257_v38 = vadd.f32 %v743_v48, %v81_v34 }
  0xd2   :  { %v1040_v49 = vpop.f32.mrf.mxu0 }
  0xd3   :  { %v311_v44 = vmax.f32 %v257_v38, 0.0  ;;  %v249_v45 = vadd.f32 %v1040_v49, %v71_v43  ;;  %v825_v49 = vld [vmem:[%s1093_s3 + $0x10] sm:$0xff]  }
  0xd4   :  { %v746_v51 = vpop.f32.mrf.mxu0 }
  0xd5   :  { %v270_v29 = vadd.f32 %v746_v51, %v96_v18  ;;  %v66_v51 = vpop.permute.xlu0 %65  ;;  %v309_v48 = vmax.f32 %v249_v45, 0.0 }
  0xd6   :  { %v261_v53 = vpop.f32.mrf.mxu0 }
  0xd7   :  { %v314_v35 = vmax.f32 %v270_v29, 0.0  ;;  %v262_v36 = vadd.f32 %v261_v53, %v86_v28  ;;  %v246_v53 = vadd.f32 %v1038_v47, %v66_v51  ;;  %v826_v47 = vld [vmem:[%s1093_s3 + $0x18] sm:$0xff]  }
  0xd8   :  { %v747_v54 = vpop.f32.mrf.mxu0 }
  0xd9   :  { %v273_v25 = vadd.f32 %v747_v54, %v101_v13  ;;  %v312_v42 = vmax.f32 %v262_v36, 0.0 }
  0xda   :  { %v264_v56 = vpop.f32.mrf.mxu0 }
  0xdb   :  { %v315_v31 = vmax.f32 %v273_v25, 0.0  ;;  %v265_v32 = vadd.f32 %v264_v56, %v91_v24 }
  0xdc   :  { %v750_v58 = vpop.f32.mrf.mxu0 }
  0xdd   :  { %v286_v14 = vadd.f32 %v750_v58, %v116_v62  ;;  %v343_v39 = vpack.c.bf16 %v315_v31, %v314_v35  ;;  %v313_v40 = vmax.f32 %v265_v32, 0.0  ;;  %v828_v58 = vld [vmem:[%s1093_s3 + $0x28] sm:$0xff]  }
  0xde   :  { %v277_v59 = vpop.f32.mrf.mxu0 }
  0xdf   :  { %v318_v22 = vmax.f32 %v286_v14, 0.0  ;;  %v278_v23 = vadd.f32 %v277_v59, %v106_v4  ;;  %v829_v59 = vld [vmem:[%s1093_s3 + $0x30] sm:$0xff]  }
  0xe0   :  { %v751_v61 = vpop.f32.mrf.mxu0 }
  0xe1   :  { %v289_v9 = vadd.f32 %v751_v61, %v121_v60  ;;  %v316_v30 = vmax.f32 %v278_v23, 0.0  ;;  %v830_v60 = vld [vmem:[%s1093_s3 + $0x38] sm:$0xff]   ;;  %v854_v61 = vmov 0.0  }
  0xe2   :  { %v280_v63 = vpop.f32.mrf.mxu0  ;;  %788 = vmatprep.subr.bf16.mxu0 %v854_v61  ;;  %804 = vmatprep.mubr.msk.bf16.mxu0 %vm855_vm1, %v854_v61 }
  0xe3   :  { %v319_v19 = vmax.f32 %v289_v9, 0.0  ;;  %v281_v20 = vadd.f32 %v280_v63, %v111_v1 }
  0xe4   :  { %v754_v0 = vpop.f32.mrf.mxu0 }
  0xe5   :  { %v302_v3 = vadd.f32 %v754_v0, %v136_v52  ;;  %v345_v26 = vpack.c.bf16 %v319_v19, %v318_v22  ;;  %v317_v27 = vmax.f32 %v281_v20, 0.0  ;;  %v310_v52 = vmax.f32 %v254_v41, 0.0 }
  0xe6   :  { %v293_v2 = vpop.f32.mrf.mxu0 }
  0xe7   :  { %v294_v6 = vadd.f32 %v293_v2, %v126_v50  ;;  %v322_v10 = vmax.f32 %v302_v3, 0.0  ;;  %v344_v33 = vpack.c.bf16 %v317_v27, %v316_v30  ;;  %v342_v50 = vpack.c.bf16 %v313_v40, %v312_v42  ;;  %v442_v3 = vpop.permute.xlu1 %441 }
  0xe8   :  { %v755_v5 = vpop.f32.mrf.mxu0  ;;  %v341_v54 = vpack.c.bf16 %v311_v44, %v310_v52 }
  0xe9   :  { %v305_v7 = vadd.f32 %v755_v5, %v141_v57  ;;  %v320_v15 = vmax.f32 %v294_v6, 0.0  ;;  %v827_v57 = vld [vmem:[%s1093_s3 + $0x20] sm:$0xff]   ;;  %v437_v5 = vpop.permute.xlu0 %436 }
  0xea   :  { %v296_v8 = vpop.f32.mrf.mxu0 }
  0xeb   :  { %v323_v11 = vmax.f32 %v305_v7, 0.0  ;;  %v297_v12 = vadd.f32 %v296_v8, %v131_v55  ;;  %v308_v55 = vmax.f32 %v246_v53, 0.0  ;;  %v432_v8 = vpop.permute.xlu1 %431 }
  0xed   :  { %v321_v16 = vmax.f32 %v297_v12, 0.0  ;;  %v347_v17 = vpack.c.bf16 %v323_v11, %v322_v10  ;;  %v340_v56 = vpack.c.bf16 %v309_v48, %v308_v55  ;;  %v427_v10 = vpop.permute.xlu0 %426 }
  0xef   :  { %v346_v21 = vpack.c.bf16 %v321_v16, %v320_v15  ;;  %756 = vmatprep.subr.bf16.mxu1 %v347_v17  ;;  %v422_v13 = vpop.permute.xlu1 %421 }
  0xf0   :  { %757 = vmatpush3.bf16.msra.mxu1 %v347_v17 }
  0xf1   :  { %758 = vmatprep.subr.bf16.mxu1 %v346_v21  ;;  %v417_v15 = vpop.permute.xlu0 %416 }
  0xf3   :  { %v412_v19 = vpop.permute.xlu1 %411 }
  0xf4   :  { %759 = vmatpush3.bf16.msra.mxu1 %v346_v21 }
  0xf5   :  { %760 = vmatprep.subr.bf16.mxu1 %v345_v26  ;;  %v407_v22 = vpop.permute.xlu0 %406 }
  0xf7   :  { %v402_v31 = vpop.permute.xlu1 %401 }
  0xf8   :  { %761 = vmatpush3.bf16.msra.mxu1 %v345_v26 }
  0xf9   :  { %762 = vmatprep.subr.bf16.mxu1 %v344_v33  ;;  %v397_v34 = vpop.permute.xlu0 %396 }
  0xfb   :  { %v392_v40 = vpop.permute.xlu1 %391 }
  0xfc   :  { %763 = vmatpush3.bf16.msra.mxu1 %v344_v33 }
  0xfd   :  { %764 = vmatprep.subr.bf16.mxu1 %v343_v39  ;;  %v387_v44 = vpop.permute.xlu0 %386 }
 0x100   :  { %765 = vmatpush3.bf16.msra.mxu1 %v343_v39 }
 0x101   :  { %766 = vmatprep.subr.bf16.mxu1 %v342_v50 }
 0x104   :  { %767 = vmatpush3.bf16.msra.mxu1 %v342_v50 }
 0x105   :  { %768 = vmatprep.subr.bf16.mxu1 %v341_v54 }
 0x108   :  { %769 = vmatpush3.bf16.msra.mxu1 %v341_v54  ;;  %v382_v54 = vpop.permute.xlu1 %381 }
 0x109   :  { %770 = vmatprep.subr.bf16.mxu1 %v340_v56 }
 0x10c   :  { %771 = vmatpush3.bf16.msra.mxu1 %v340_v56  ;;  %v377_v56 = vpop.permute.xlu0 %376 }
 0x10f   :  { %773 = vmatmul.mubr.bf16.vlgmr.msra.gmra.mxu1 %v824_v46 }
 0x110   :  { %776 = vmatprep.mubr.bf16.mxu1 %v825_v49 }
 0x117   :  { %777 = vmatmul.mubr.bf16.gmra.mxu1 %v826_v47 }
 0x118   :  { %780 = vmatprep.mubr.bf16.mxu1 %v827_v57 }
 0x11f   :  { %781 = vmatmul.mubr.bf16.gmra.mxu1 %v828_v58 }
 0x120   :  { %784 = vmatprep.mubr.bf16.mxu1 %v829_v59  ;;  %v372_v59 = vpop.permute.xlu1 %371 }
 0x127   :  { %785 = vmatmul.mubr.bf16.gmra.mxu1 %v830_v60 }
 0x1cf   :  { %v1068_v62 = vpop.f32.mrf.mxu1 }
 0x1d0   :  { %v535_v57 = vadd.f32 %v1068_v62, %v377_v56 }
 0x1d1   :  { %v1070_v63 = vpop.f32.mrf.mxu1 }
 0x1d3   :  { %v775_v0 = vpop.f32.mrf.mxu1 }
 0x1d4   :  { %v538_v46 = vadd.f32 %v775_v0, %v382_v54 }
 0x1d5   :  { %v1072_v1 = vpop.f32.mrf.mxu1 }
 0x1d6   :  { %v592_v60 = vmax.f32 %v538_v46, 0.0 }
 0x1d7   :  { %v778_v2 = vpop.f32.mrf.mxu1 }
 0x1d8   :  { %v551_v45 = vadd.f32 %v778_v2, %v397_v34  ;;  %v530_v2 = vadd.f32 %v1072_v1, %v372_v59  ;;  %v605_v1 = vld [vmem:[%s1095_s5] sm:$0x1] }
 0x1d9   :  { %v542_v4 = vpop.f32.mrf.mxu1 }
 0x1da   :  { %v595_v48 = vmax.f32 %v551_v45, 0.0  ;;  %v543_v55 = vadd.f32 %v542_v4, %v387_v44  ;;  %v591_v4 = vmax.f32 %v535_v57, 0.0 }
 0x1db   :  { %v779_v6 = vpop.f32.mrf.mxu1 }
 0x1dc   :  { %v554_v41 = vadd.f32 %v779_v6, %v402_v31  ;;  %v593_v58 = vmax.f32 %v543_v55, 0.0  ;;  %v607_v0 = vpack.c.bf16 %v592_v60, %v591_v4 }
 0x1dd   :  { %v545_v7 = vpop.f32.mrf.mxu1 }
 0x1de   :  { %v596_v51 = vmax.f32 %v554_v41, 0.0  ;;  %v546_v52 = vadd.f32 %v545_v7, %v392_v40  ;;  %v590_v7 = vmax.f32 %v530_v2, 0.0 }
 0x1df   :  { %v782_v9 = vpop.f32.mrf.mxu1 }
 0x1e0   :  { %v567_v32 = vadd.f32 %v782_v9, %v417_v15  ;;  %v609_v49 = vpack.c.bf16 %v596_v51, %v595_v48  ;;  %v594_v47 = vmax.f32 %v546_v52, 0.0  ;;  %v620_v9 = vlaneseq }
 0x1e1   :  { %v558_v11 = vpop.f32.mrf.mxu1 }
 0x1e2   :  { %v599_v38 = vmax.f32 %v567_v32, 0.0  ;;  %v559_v39 = vadd.f32 %v558_v11, %v407_v22 }
 0x1e3   :  { %v783_v12 = vpop.f32.mrf.mxu1 }
 0x1e4   :  { %v570_v28 = vadd.f32 %v783_v12, %v422_v13  ;;  %v597_v50 = vmax.f32 %v559_v39, 0.0 }
 0x1e5   :  { %v561_v14 = vpop.f32.mrf.mxu1 }
 0x1e6   :  { %v600_v35 = vmax.f32 %v570_v28, 0.0  ;;  %v562_v36 = vadd.f32 %v561_v14, %v412_v19 }
 0x1e7   :  { %v786_v16 = vpop.f32.mrf.mxu1 }
 0x1e8   :  { %v583_v18 = vadd.f32 %v786_v16, %v437_v5  ;;  %v611_v42 = vpack.c.bf16 %v600_v35, %v599_v38  ;;  %v598_v43 = vmax.f32 %v562_v36, 0.0  ;;  %v367_v5 = vpop.permute.xlu0 %366 }
 0x1e9   :  { %v574_v17 = vpop.f32.mrf.mxu1  ;;  %v527_v6 = vadd.f32 %v1070_v63, %v367_v5 }
 0x1ea   :  { %v603_v24 = vmax.f32 %v583_v18, 0.0  ;;  %v575_v25 = vadd.f32 %v574_v17, %v427_v10  ;;  %v610_v53 = vpack.c.bf16 %v598_v43, %v597_v50  ;;  %v621_v10 = vshrl.u32 %v620_v9, 7 }
 0x1eb   :  { %v787_v20 = vpop.f32.mrf.mxu1 }
 0x1ec   :  { %v586_v21 = vadd.f32 %v787_v20, %v442_v3  ;;  %v601_v33 = vmax.f32 %v575_v25, 0.0  ;;  %v608_v3 = vpack.c.bf16 %v594_v47, %v593_v58  ;;  %v622_v11 = vsub.s32 0, %v621_v10  ;;  %v618_v63 = vpop.permute.xlu0 %617 }
 0x1ed   :  { %v577_v23 = vpop.f32.mrf.mxu1 }
 0x1ee   :  { %v604_v26 = vmax.f32 %v586_v21, 0.0  ;;  %v578_v27 = vadd.f32 %v577_v23, %v432_v8  ;;  %v589_v8 = vmax.f32 %v527_v6, 0.0  ;;  %v623_v12 = vrot.slane %v618_v63, %v622_v11 }
 0x1f0   :  { %v613_v29 = vpack.c.bf16 %v604_v26, %v603_v24  ;;  %v602_v30 = vmax.f32 %v578_v27, 0.0  ;;  %v606_v62 = vpack.c.bf16 %v590_v7, %v589_v8 }
 0x1f2   :  { %789 = vmatpush3.bf16.msra.mxu0 %v613_v29  ;;  %v612_v37 = vpack.c.bf16 %v602_v30, %v601_v33 }
 0x1f3   :  { %790 = vmatprep.subr.bf16.mxu0 %v854_v61 }
 0x1f6   :  { %791 = vmatpush3.bf16.msra.mxu0 %v612_v37 }
 0x1f7   :  { %792 = vmatprep.subr.bf16.mxu0 %v854_v61 }
 0x1fa   :  { %793 = vmatpush3.bf16.msra.mxu0 %v611_v42 }
 0x1fb   :  { %794 = vmatprep.subr.bf16.mxu0 %v854_v61 }
 0x1fe   :  { %795 = vmatpush3.bf16.msra.mxu0 %v610_v53 }
 0x1ff   :  { %796 = vmatprep.subr.bf16.mxu0 %v854_v61 }
 0x202   :  { %797 = vmatpush3.bf16.msra.mxu0 %v609_v49 }
 0x203   :  { %798 = vmatprep.subr.bf16.mxu0 %v854_v61 }
 0x206   :  { %799 = vmatpush3.bf16.msra.mxu0 %v608_v3 }
 0x207   :  { %800 = vmatprep.subr.bf16.mxu0 %v854_v61 }
 0x20a   :  { %801 = vmatpush3.bf16.msra.mxu0 %v607_v0 }
 0x20b   :  { %802 = vmatprep.subr.bf16.mxu0 %v854_v61 }
 0x20e   :  { %803 = vmatpush3.bf16.msra.mxu0 %v606_v62 }
 0x211   :  { %805 = vmatmul.mubr.bf16.vlgmr.msra.gmra.mxu0 %v605_v1 }
 0x2d1   :  { %v658_v13 = vpop.f32.mrf.mxu0 }
 0x2d2   :  { %v659_v14 = vadd.f32 %v658_v13, %v623_v12 }
 0x2d3   :  { %v806_v15 = vpop.f32.mrf.mxu0 }
 0x2d4   :  { %665 = vst.msk [vmem:[#allocation3] sm:$0x1] %vm664_vm2, %v659_v14 }
 0x2d5   :  { %v661_v61 = vpop.f32.mrf.mxu0 }
 0x2d6   :  { %842 = shalt.err (!%p839_p4)
}
 0x2d7   :  { %675 = dma.vmem_to_hbm [thread:$0]  %s673_s21, 16, %s1097_s7, [#allocation4]   ;;  %v807_v16 = vpop.f32.mrf.mxu0 }
 0x2d8   :  { %851 = dma.done.wait [#allocation4], 16  }
 0x2d9   :  { %852 = vsyncadd [#allocation4], 4294967280 }
 0x2da   :  { %679 = vsyncpa [#allocation4], 1 }

</bundles_post_ra>
